<compile_context>
chip_gen: v7x
topology: tpu7x:2x2x1
jax: 0.10.0
libtpu: 0.0.40
codegen_flags: <defaults>
</compile_context>

<pallas_src>
import jax
import jax.numpy as jnp
from jax.experimental import pallas as pl
from jax.experimental.pallas import tpu as pltpu


# ---------------------------------------------------------------------------
# Kernel
# ---------------------------------------------------------------------------
def double_conv_kernel(x_ref, t1_ref, b1_ref, t2_ref, b2_ref, o_ref,
                       xpad_ref, hpad_ref):
    """Fused DoubleConv on one batch tile.

    Layout: activations are 2-D "lane folded" buffers: rows = image rows
    (sublane axis), columns = W*C with channels fastest (lane axis).  A 3x3
    conv with padding=1 is then 3 MXU matmuls (one per kernel row ky) of the
    zero-padded row buffer against a banded weight matrix T[ky] of shape
    ((W+2)*Cin, W*Cout) -- no per-tap slicing / im2col copies.

    x_ref : (BT, H, W*Cin)            bf16  input tile
    t1_ref: (3, (W+2)*Cin,  W*Cmid)   bf16  conv1 banded weights (BN1 scale folded in)
    b1_ref: (1, W*Cmid)               f32   conv1 bias + BN1 shift, tiled over W
    t2_ref: (3, (W+2)*Cmid, W*Cout)   bf16  conv2 banded weights (BN2 scale folded in)
    b2_ref: (1, W*Cout)               f32
    o_ref : (BT, H, W*Cout)           f32   output tile
    xpad_ref: VMEM (H+2, (W+2)*Cin)   f32   zero-padded input rows
    hpad_ref: VMEM (H+2, (W+2)*Cmid)  f32   zero-padded intermediate rows (never hits HBM)
    """
    BT, H, WCin = x_ref.shape
    WCmid = b1_ref.shape[1]
    WCout = o_ref.shape[2]

    # Zero the halo buffers once per grid step; interiors are rewritten per image.
    xpad_ref[...] = jnp.zeros_like(xpad_ref)
    hpad_ref[...] = jnp.zeros_like(hpad_ref)

    for b in range(BT):                        # small static batch tile, unrolled
        # ---- stage 1: conv3x3 + BN1 (folded) + ReLU ----
        xpad_ref[1:H + 1, 0:WCin] = x_ref[b].astype(jnp.float32)
        acc = jnp.zeros((H, WCmid), jnp.float32)
        for ky in range(3):                    # row-offset slices only; K = (W+2)*Cin
            slab = xpad_ref[ky:ky + H, :].astype(jnp.bfloat16)
            acc = acc + jnp.dot(slab, t1_ref[ky],
                                preferred_element_type=jnp.float32)
        h = jnp.maximum(acc + b1_ref[0], 0.0)

        # ---- stage 2: conv3x3 + BN2 (folded) + ReLU ----
        hpad_ref[1:H + 1, 0:WCmid] = h
        acc2 = jnp.zeros((H, WCout), jnp.float32)
        for ky in range(3):                    # K = (W+2)*Cmid
            slab = hpad_ref[ky:ky + H, :].astype(jnp.bfloat16)
            acc2 = acc2 + jnp.dot(slab, t2_ref[ky],
                                  preferred_element_type=jnp.float32)
        o_ref[b] = jnp.maximum(acc2 + b2_ref[0], 0.0).astype(o_ref.dtype)


# ---------------------------------------------------------------------------
# Wrapper
# ---------------------------------------------------------------------------
def double_conv_forward(x_nchw, params, *, batch_tile=1):
    """DoubleConv forward (eval-mode BN).  Input/output are NCHW like PyTorch."""
    N, Cin, H, W = x_nchw.shape
    WCin = W * Cin
    WCmid = params["b1"].shape[1]
    WCout = params["b2"].shape[1]
    Cmid, Cout = WCmid // W, WCout // W
    assert N % batch_tile == 0

    # NCHW -> NHWC -> (N, H, W*Cin): channels fastest on the lane axis, bf16 in HBM.
    x = jnp.transpose(x_nchw, (0, 2, 3, 1)).reshape(N, H, WCin).astype(jnp.bfloat16)

    out = pl.pallas_call(
        double_conv_kernel,
        out_shape=jax.ShapeDtypeStruct((N, H, WCout), jnp.float32),
        grid=(N // batch_tile,),
        in_specs=[
            pl.BlockSpec((batch_tile, H, WCin), lambda n: (n, 0, 0)),
            pl.BlockSpec((3, (W + 2) * Cin, WCmid), lambda n: (0, 0, 0)),
            pl.BlockSpec((1, WCmid), lambda n: (0, 0)),
            pl.BlockSpec((3, (W + 2) * Cmid, WCout), lambda n: (0, 0, 0)),
            pl.BlockSpec((1, WCout), lambda n: (0, 0)),
        ],
        out_specs=pl.BlockSpec((batch_tile, H, WCout), lambda n: (n, 0, 0)),
        scratch_shapes=[
            pltpu.VMEM((H + 2, (W + 2) * Cin), jnp.float32),
            pltpu.VMEM((H + 2, (W + 2) * Cmid), jnp.float32),
        ],
        compiler_params=pltpu.CompilerParams(
            dimension_semantics=("parallel",)),
        # TODO(synk): for large H/W/C add an H-strip grid axis with a 1-row halo
        # (overlapping index_map) and set vmem_limit_bytes for v7x's 64 MiB VMEM.
    )(x, params["t1"], params["b1"], params["t2"], params["b2"])

    out = out.reshape(N, H, W, Cout)
    return jnp.transpose(out, (0, 3, 1, 2))            # NHWC -> NCHW


# ---------------------------------------------------------------------------
# Parameter packing (BN folding + banded/Toeplitz weight construction)
# ---------------------------------------------------------------------------
def _banded_weights(w_hwio, W):
    """Pack 3x3 HWIO weights into 3 banded matrices T[ky]: ((W+2)*Cin, W*Cout).

    For a zero-padded row buffer P with P[r, w*Cin + c] = x[r-1, w, c]
    (rows 0 and H+1, and the trailing 2*Cin lane columns, are zero), the conv is
        O[h, w*Cout + o] = sum_ky  P[h+ky, :] @ T[ky].
    """
    KH, KW, Cin, Cout = w_hwio.shape
    j = jnp.arange(W + 2)
    w = jnp.arange(W)
    kx = jnp.arange(KW)
    # sel[kx, j, w] == 1 iff input column j feeds output column w via tap kx
    # (padding = 1  =>  j == w + kx - 1).
    sel = (j[None, :, None] == (w[None, None, :] + kx[:, None, None] - 1))
    sel = sel.astype(w_hwio.dtype)
    t = jnp.einsum("kjw,ykco->yjcwo", sel, w_hwio)      # (KH, W+2, Cin, W, Cout)
    return t.reshape(KH, (W + 2) * Cin, W * Cout)


def pack_double_conv_params(raw, W, eps=1e-5):
    """Fold eval-mode BN into the convs and pack weights for the kernel layout."""
    s1 = raw["g1"] / jnp.sqrt(raw["v1"] + eps)
    s2 = raw["g2"] / jnp.sqrt(raw["v2"] + eps)
    # OIHW -> HWIO, with the BN scale folded into the output channels.
    w1 = jnp.transpose(raw["w1"], (2, 3, 1, 0)) * s1
    w2 = jnp.transpose(raw["w2"], (2, 3, 1, 0)) * s2
    b1 = (raw["b1"] - raw["m1"]) * s1 + raw["beta1"]
    b2 = (raw["b2"] - raw["m2"]) * s2 + raw["beta2"]
    return {
        "t1": _banded_weights(w1, W).astype(jnp.bfloat16),
        "t2": _banded_weights(w2, W).astype(jnp.bfloat16),
        "b1": jnp.tile(b1, W)[None, :].astype(jnp.float32),
        "b2": jnp.tile(b2, W)[None, :].astype(jnp.float32),
    }


def init_double_conv_params(key, in_ch, out_ch):
    """Deterministic synthetic parameters matching DoubleConv(in_ch, out_ch)."""
    ks = jax.random.split(key, 12)
    return dict(
        w1=jax.random.normal(ks[0], (out_ch, in_ch, 3, 3), jnp.float32) * 0.1,
        b1=jax.random.normal(ks[1], (out_ch,), jnp.float32) * 0.1,
        g1=1.0 + 0.1 * jax.random.normal(ks[2], (out_ch,), jnp.float32),
        beta1=0.1 * jax.random.normal(ks[3], (out_ch,), jnp.float32),
        m1=0.05 * jax.random.normal(ks[4], (out_ch,), jnp.float32),
        v1=1.0 + 0.1 * jax.random.uniform(ks[5], (out_ch,), jnp.float32),
        w2=jax.random.normal(ks[6], (out_ch, out_ch, 3, 3), jnp.float32) * 0.1,
        b2=jax.random.normal(ks[7], (out_ch,), jnp.float32) * 0.1,
        g2=1.0 + 0.1 * jax.random.normal(ks[8], (out_ch,), jnp.float32),
        beta2=0.1 * jax.random.normal(ks[9], (out_ch,), jnp.float32),
        m2=0.05 * jax.random.normal(ks[10], (out_ch,), jnp.float32),
        v2=1.0 + 0.1 * jax.random.uniform(ks[11], (out_ch,), jnp.float32),
    )


# ---------------------------------------------------------------------------
# Pure-JAX reference (mirrors the PyTorch eval-mode forward)
# ---------------------------------------------------------------------------
def _reference_forward(x_nchw, raw, eps=1e-5):
    def conv(x, w, b):
        y = jax.lax.conv_general_dilated(
            x, w, window_strides=(1, 1), padding=((1, 1), (1, 1)),
            dimension_numbers=("NCHW", "OIHW", "NCHW"))
        return y + b[None, :, None, None]

    def bn(x, g, beta, m, v):
        inv = (g / jnp.sqrt(v + eps))[None, :, None, None]
        return (x - m[None, :, None, None]) * inv + beta[None, :, None, None]

    h = jnp.maximum(bn(conv(x_nchw, raw["w1"], raw["b1"]),
                       raw["g1"], raw["beta1"], raw["m1"], raw["v1"]), 0.0)
    return jnp.maximum(bn(conv(h, raw["w2"], raw["b2"]),
                          raw["g2"], raw["beta2"], raw["m2"], raw["v2"]), 0.0)


if __name__ == "__main__":
    key = jax.random.PRNGKey(0)
    k_x, k_p = jax.random.split(key)

    N, IN_CH, OUT_CH, H, W = 2, 4, 8, 16, 16
    x = jax.random.normal(k_x, (N, IN_CH, H, W), jnp.float32)    # NCHW, like torch

    raw = init_double_conv_params(k_p, IN_CH, OUT_CH)
    params = pack_double_conv_params(raw, W)

    ref = _reference_forward(x, raw)

    # batch_tile=1: one image per grid step (2 parallel steps -> feeds both v7x TCs).
    out = jax.block_until_ready(double_conv_forward(x, params, batch_tile=1))
    # batch_tile=N: whole batch in one grid step (amortises per-step overhead, v5e/v6e).
    out_big = jax.block_until_ready(double_conv_forward(x, params, batch_tile=N))

    assert out.shape == (N, OUT_CH, H, W)
    err = float(jnp.max(jnp.abs(out - ref)))
    err_big = float(jnp.max(jnp.abs(out_big - ref)))
    # bf16 MXU operands vs. the f32 XLA reference -> tolerance loosened accordingly.
    assert jnp.allclose(out, ref, atol=5e-2, rtol=5e-2), err
    assert jnp.allclose(out_big, ref, atol=5e-2, rtol=5e-2), err_big

    print("KERNEL_OK")
</pallas_src>

<mosaic_0001>
module attributes {stable_mosaic.version = 11 : i64} {
  func.func @double_conv_kernel(%arg0: i32, %arg1: memref<1x16x64xbf16, #tpu.memory_space<vmem>>, %arg2: memref<3x72x128xbf16, #tpu.memory_space<vmem>>, %arg3: memref<1x128xf32, #tpu.memory_space<vmem>>, %arg4: memref<3x144x128xbf16, #tpu.memory_space<vmem>>, %arg5: memref<1x128xf32, #tpu.memory_space<vmem>>, %arg6: memref<1x16x128xf32, #tpu.memory_space<vmem>>, %arg7: memref<18x72xf32, #tpu.memory_space<vmem>>, %arg8: memref<18x144xf32, #tpu.memory_space<vmem>>) attributes {dimension_semantics = [#tpu.dimension_semantics<parallel>], iteration_bounds = array<i64: 2>, scalar_prefetch = 0 : i64, scratch_operands = 2 : i64, tpu.core_type = #tpu.core_type<tc>, window_params = [{transform_indices = @transform_0, window_bounds = array<i64: 1, 16, 64>}, {pipeline_mode = #tpu.pipeline_mode<synchronous>, transform_indices = @transform_1, window_bounds = array<i64: 3, 72, 128>}, {pipeline_mode = #tpu.pipeline_mode<synchronous>, transform_indices = @transform_2, window_bounds = array<i64: 1, 128>}, {pipeline_mode = #tpu.pipeline_mode<synchronous>, transform_indices = @transform_3, window_bounds = array<i64: 3, 144, 128>}, {pipeline_mode = #tpu.pipeline_mode<synchronous>, transform_indices = @transform_4, window_bounds = array<i64: 1, 128>}, {transform_indices = @transform_5, window_bounds = array<i64: 1, 16, 128>}]} {
    %cst = arith.constant 0.000000e+00 : f32
    %0 = vector.broadcast %cst : f32 to vector<18x72xf32>
    %c0 = arith.constant 0 : index
    %c0_0 = arith.constant 0 : index
    %1 = vector.load %arg7[%c0, %c0_0] : memref<18x72xf32, #tpu.memory_space<vmem>>, vector<18x72xf32>
    tpu.vector_store %arg7[%c0, %c0_0], %0 {strides = array<i32>} : memref<18x72xf32, #tpu.memory_space<vmem>>, vector<18x72xf32>,
    %cst_1 = arith.constant 0.000000e+00 : f32
    %2 = vector.broadcast %cst_1 : f32 to vector<18x144xf32>
    %c0_2 = arith.constant 0 : index
    %c0_3 = arith.constant 0 : index
    %3 = vector.load %arg8[%c0_2, %c0_3] : memref<18x144xf32, #tpu.memory_space<vmem>>, vector<18x144xf32>
    tpu.vector_store %arg8[%c0_2, %c0_3], %2 {strides = array<i32>} : memref<18x144xf32, #tpu.memory_space<vmem>>, vector<18x144xf32>,
    %c0_4 = arith.constant 0 : index
    %c0_5 = arith.constant 0 : index
    %c0_6 = arith.constant 0 : index
    %4 = vector.load %arg1[%c0_4, %c0_5, %c0_6] : memref<1x16x64xbf16, #tpu.memory_space<vmem>>, vector<1x16x64xbf16>
    %5 = vector.shape_cast %4 : vector<1x16x64xbf16> to vector<16x64xbf16>
    %6 = arith.extf %5 : vector<16x64xbf16> to vector<16x64xf32>
    %c1 = arith.constant 1 : index
    %c0_7 = arith.constant 0 : index
    %7 = vector.load %arg7[%c1, %c0_7] : memref<18x72xf32, #tpu.memory_space<vmem>>, vector<16x64xf32>
    tpu.vector_store %arg7[%c1, %c0_7], %6 {strides = array<i32>} : memref<18x72xf32, #tpu.memory_space<vmem>>, vector<16x64xf32>,
    %cst_8 = arith.constant 0.000000e+00 : f32
    %8 = vector.broadcast %cst_8 : f32 to vector<16x128xf32>
    %c0_9 = arith.constant 0 : index
    %c0_10 = arith.constant 0 : index
    %9 = vector.load %arg7[%c0_9, %c0_10] : memref<18x72xf32, #tpu.memory_space<vmem>>, vector<16x72xf32>
    %10 = arith.truncf %9 : vector<16x72xf32> to vector<16x72xbf16>
    %c0_11 = arith.constant 0 : index
    %c0_12 = arith.constant 0 : index
    %c0_13 = arith.constant 0 : index
    %11 = vector.load %arg2[%c0_11, %c0_12, %c0_13] : memref<3x72x128xbf16, #tpu.memory_space<vmem>>, vector<1x72x128xbf16>
    %12 = vector.shape_cast %11 : vector<1x72x128xbf16> to vector<72x128xbf16>
    %cst_14 = arith.constant dense<0.000000e+00> : vector<16x128xf32>
    %13 = tpu.matmul %10, %12, %cst_14 {dimension_numbers = #tpu.dot_dimension_numbers<[1], [0], [0], [1], [0, 0, 1, 1], [], []>} : vector<16x72xbf16>, vector<72x128xbf16>, vector<16x128xf32> -> vector<16x128xf32>
    %14 = arith.addf %8, %13 : vector<16x128xf32>
    %c1_15 = arith.constant 1 : index
    %c0_16 = arith.constant 0 : index
    %15 = vector.load %arg7[%c1_15, %c0_16] : memref<18x72xf32, #tpu.memory_space<vmem>>, vector<16x72xf32>
    %16 = arith.truncf %15 : vector<16x72xf32> to vector<16x72xbf16>
    %c1_17 = arith.constant 1 : index
    %c0_18 = arith.constant 0 : index
    %c0_19 = arith.constant 0 : index
    %17 = vector.load %arg2[%c1_17, %c0_18, %c0_19] : memref<3x72x128xbf16, #tpu.memory_space<vmem>>, vector<1x72x128xbf16>
    %18 = vector.shape_cast %17 : vector<1x72x128xbf16> to vector<72x128xbf16>
    %cst_20 = arith.constant dense<0.000000e+00> : vector<16x128xf32>
    %19 = tpu.matmul %16, %18, %cst_20 {dimension_numbers = #tpu.dot_dimension_numbers<[1], [0], [0], [1], [0, 0, 1, 1], [], []>} : vector<16x72xbf16>, vector<72x128xbf16>, vector<16x128xf32> -> vector<16x128xf32>
    %20 = arith.addf %14, %19 : vector<16x128xf32>
    %c2 = arith.constant 2 : index
    %c0_21 = arith.constant 0 : index
    %21 = vector.load %arg7[%c2, %c0_21] : memref<18x72xf32, #tpu.memory_space<vmem>>, vector<16x72xf32>
    %22 = arith.truncf %21 : vector<16x72xf32> to vector<16x72xbf16>
    %c2_22 = arith.constant 2 : index
    %c0_23 = arith.constant 0 : index
    %c0_24 = arith.constant 0 : index
    %23 = vector.load %arg2[%c2_22, %c0_23, %c0_24] : memref<3x72x128xbf16, #tpu.memory_space<vmem>>, vector<1x72x128xbf16>
    %24 = vector.shape_cast %23 : vector<1x72x128xbf16> to vector<72x128xbf16>
    %cst_25 = arith.constant dense<0.000000e+00> : vector<16x128xf32>
    %25 = tpu.matmul %22, %24, %cst_25 {dimension_numbers = #tpu.dot_dimension_numbers<[1], [0], [0], [1], [0, 0, 1, 1], [], []>} : vector<16x72xbf16>, vector<72x128xbf16>, vector<16x128xf32> -> vector<16x128xf32>
    %26 = arith.addf %20, %25 : vector<16x128xf32>
    %c0_26 = arith.constant 0 : index
    %c0_27 = arith.constant 0 : index
    %27 = vector.load %arg3[%c0_26, %c0_27] : memref<1x128xf32, #tpu.memory_space<vmem>>, vector<1x128xf32>
    %28 = vector.shape_cast %27 : vector<1x128xf32> to vector<128xf32>
    %29 = vector.shape_cast %28 : vector<128xf32> to vector<1x128xf32>
    %30 = vector.broadcast %29 : vector<1x128xf32> to vector<16x128xf32>
    %31 = arith.addf %26, %30 : vector<16x128xf32>
    %cst_28 = arith.constant 0.000000e+00 : f32
    %32 = vector.broadcast %cst_28 : f32 to vector<16x128xf32>
    %33 = arith.maximumf %31, %32 : vector<16x128xf32>
    %c1_29 = arith.constant 1 : index
    %c0_30 = arith.constant 0 : index
    %34 = vector.load %arg8[%c1_29, %c0_30] : memref<18x144xf32, #tpu.memory_space<vmem>>, vector<16x128xf32>
    tpu.vector_store %arg8[%c1_29, %c0_30], %33 {strides = array<i32>} : memref<18x144xf32, #tpu.memory_space<vmem>>, vector<16x128xf32>,
    %cst_31 = arith.constant 0.000000e+00 : f32
    %35 = vector.broadcast %cst_31 : f32 to vector<16x128xf32>
    %c0_32 = arith.constant 0 : index
    %c0_33 = arith.constant 0 : index
    %36 = vector.load %arg8[%c0_32, %c0_33] : memref<18x144xf32, #tpu.memory_space<vmem>>, vector<16x144xf32>
    %37 = arith.truncf %36 : vector<16x144xf32> to vector<16x144xbf16>
    %c0_34 = arith.constant 0 : index
    %c0_35 = arith.constant 0 : index
    %c0_36 = arith.constant 0 : index
    %38 = vector.load %arg4[%c0_34, %c0_35, %c0_36] : memref<3x144x128xbf16, #tpu.memory_space<vmem>>, vector<1x144x128xbf16>
    %39 = vector.shape_cast %38 : vector<1x144x128xbf16> to vector<144x128xbf16>
    %cst_37 = arith.constant dense<0.000000e+00> : vector<16x128xf32>
    %40 = tpu.matmul %37, %39, %cst_37 {dimension_numbers = #tpu.dot_dimension_numbers<[1], [0], [0], [1], [0, 0, 1, 1], [], []>} : vector<16x144xbf16>, vector<144x128xbf16>, vector<16x128xf32> -> vector<16x128xf32>
    %41 = arith.addf %35, %40 : vector<16x128xf32>
    %c1_38 = arith.constant 1 : index
    %c0_39 = arith.constant 0 : index
    %42 = vector.load %arg8[%c1_38, %c0_39] : memref<18x144xf32, #tpu.memory_space<vmem>>, vector<16x144xf32>
    %43 = arith.truncf %42 : vector<16x144xf32> to vector<16x144xbf16>
    %c1_40 = arith.constant 1 : index
    %c0_41 = arith.constant 0 : index
    %c0_42 = arith.constant 0 : index
    %44 = vector.load %arg4[%c1_40, %c0_41, %c0_42] : memref<3x144x128xbf16, #tpu.memory_space<vmem>>, vector<1x144x128xbf16>
    %45 = vector.shape_cast %44 : vector<1x144x128xbf16> to vector<144x128xbf16>
    %cst_43 = arith.constant dense<0.000000e+00> : vector<16x128xf32>
    %46 = tpu.matmul %43, %45, %cst_43 {dimension_numbers = #tpu.dot_dimension_numbers<[1], [0], [0], [1], [0, 0, 1, 1], [], []>} : vector<16x144xbf16>, vector<144x128xbf16>, vector<16x128xf32> -> vector<16x128xf32>
    %47 = arith.addf %41, %46 : vector<16x128xf32>
    %c2_44 = arith.constant 2 : index
    %c0_45 = arith.constant 0 : index
    %48 = vector.load %arg8[%c2_44, %c0_45] : memref<18x144xf32, #tpu.memory_space<vmem>>, vector<16x144xf32>
    %49 = arith.truncf %48 : vector<16x144xf32> to vector<16x144xbf16>
    %c2_46 = arith.constant 2 : index
    %c0_47 = arith.constant 0 : index
    %c0_48 = arith.constant 0 : index
    %50 = vector.load %arg4[%c2_46, %c0_47, %c0_48] : memref<3x144x128xbf16, #tpu.memory_space<vmem>>, vector<1x144x128xbf16>
    %51 = vector.shape_cast %50 : vector<1x144x128xbf16> to vector<144x128xbf16>
    %cst_49 = arith.constant dense<0.000000e+00> : vector<16x128xf32>
    %52 = tpu.matmul %49, %51, %cst_49 {dimension_numbers = #tpu.dot_dimension_numbers<[1], [0], [0], [1], [0, 0, 1, 1], [], []>} : vector<16x144xbf16>, vector<144x128xbf16>, vector<16x128xf32> -> vector<16x128xf32>
    %53 = arith.addf %47, %52 : vector<16x128xf32>
    %c0_50 = arith.constant 0 : index
    %c0_51 = arith.constant 0 : index
    %54 = vector.load %arg5[%c0_50, %c0_51] : memref<1x128xf32, #tpu.memory_space<vmem>>, vector<1x128xf32>
    %55 = vector.shape_cast %54 : vector<1x128xf32> to vector<128xf32>
    %56 = vector.shape_cast %55 : vector<128xf32> to vector<1x128xf32>
    %57 = vector.broadcast %56 : vector<1x128xf32> to vector<16x128xf32>
    %58 = arith.addf %53, %57 : vector<16x128xf32>
    %cst_52 = arith.constant 0.000000e+00 : f32
    %59 = vector.broadcast %cst_52 : f32 to vector<16x128xf32>
    %60 = arith.maximumf %58, %59 : vector<16x128xf32>
    %c0_53 = arith.constant 0 : index
    %c0_54 = arith.constant 0 : index
    %c0_55 = arith.constant 0 : index
    %61 = vector.load %arg6[%c0_53, %c0_54, %c0_55] : memref<1x16x128xf32, #tpu.memory_space<vmem>>, vector<1x16x128xf32>
    %62 = vector.shape_cast %61 : vector<1x16x128xf32> to vector<16x128xf32>
    %63 = vector.shape_cast %60 : vector<16x128xf32> to vector<1x16x128xf32>
    tpu.vector_store %arg6[%c0_53, %c0_54, %c0_55], %63 {strides = array<i32>} : memref<1x16x128xf32, #tpu.memory_space<vmem>>, vector<1x16x128xf32>,
    return
  }
  func.func @transform_0(%arg0: i32) -> (i32, i32, i32) {
    %c0_i32 = arith.constant 0 : i32
    %c0_i32_0 = arith.constant 0 : i32
    %c0_i32_1 = arith.constant 0 : i32
    return %arg0, %c0_i32, %c0_i32_0 : i32, i32, i32
  }
  func.func @transform_1(%arg0: i32) -> (i32, i32, i32) {
    %c0_i32 = arith.constant 0 : i32
    %c0_i32_0 = arith.constant 0 : i32
    %c0_i32_1 = arith.constant 0 : i32
    %c0_i32_2 = arith.constant 0 : i32
    return %c0_i32, %c0_i32_0, %c0_i32_1 : i32, i32, i32
  }
  func.func @transform_2(%arg0: i32) -> (i32, i32) {
    %c0_i32 = arith.constant 0 : i32
    %c0_i32_0 = arith.constant 0 : i32
    %c0_i32_1 = arith.constant 0 : i32
    return %c0_i32, %c0_i32_0 : i32, i32
  }
  func.func @transform_3(%arg0: i32) -> (i32, i32, i32) {
    %c0_i32 = arith.constant 0 : i32
    %c0_i32_0 = arith.constant 0 : i32
    %c0_i32_1 = arith.constant 0 : i32
    %c0_i32_2 = arith.constant 0 : i32
    return %c0_i32, %c0_i32_0, %c0_i32_1 : i32, i32, i32
  }
  func.func @transform_4(%arg0: i32) -> (i32, i32) {
    %c0_i32 = arith.constant 0 : i32
    %c0_i32_0 = arith.constant 0 : i32
    %c0_i32_1 = arith.constant 0 : i32
    return %c0_i32, %c0_i32_0 : i32, i32
  }
  func.func @transform_5(%arg0: i32) -> (i32, i32, i32) {
    %c0_i32 = arith.constant 0 : i32
    %c0_i32_0 = arith.constant 0 : i32
    %c0_i32_1 = arith.constant 0 : i32
    return %arg0, %c0_i32, %c0_i32_0 : i32, i32, i32
  }
}

</mosaic_0001>

<bundles_post_ra>
// kernel: tpu_custom_call.1
= control target key start
LH: loop header
LB: loop body
LE: loop exit
PB: predicated region body
PF: predicated region fallthrough
CT: control target
= control target key end

     0   :  { %10 = vsyncpa [#allocation5], 0  ;;  %s1885_s0 = inlined_call_operand.hbm [shape: bf16[2,16,64], index: 0, kind: input, shape index: {}]   ;;  %s1886_s1 = inlined_call_operand.hbm [shape: bf16[3,72,128], index: 1, kind: input, shape index: {}]   ;;  %s1887_s2 = inlined_call_operand.vmem [shape: f32[1,128], index: 2, kind: input, shape index: {}]   ;;  %s1888_s3 = inlined_call_operand.hbm [shape: bf16[3,144,128], index: 3, kind: input, shape index: {}]   ;;  %s1889_s4 = inlined_call_operand.vmem [shape: f32[1,128], index: 4, kind: input, shape index: {}]   ;;  %s1890_s5 = inlined_call_operand.hbm [shape: f32[2,16,128], index: 5, kind: output, shape index: {}]  }
   0x1   :  { %12 = vsyncpa [#allocation5 + $0x1], 0 }
   0x2   :  { %13 = vsyncpa [#allocation8], 0 }
   0x3   :  { %14 = vsyncpa [#allocation6], 0 }
   0x4   :  { %16 = vsyncpa [#allocation6 + $0x1], 0  ;;  %s1559_s18 = smov 0   ;;  %s1561_s19 = smov 0  }
   0x5   :  { %s1563_s20 = smov 0   ;;  %s1565_s21 = smov 0  }
   0x6 LB: > { %s1580_s22 = sadd.s32 4294967295, %s1516_s21   ;;  %s1110_s23 = sadd.s32 4294967294, %s1516_s21   ;;  %s1516_s21 = sphi %s1565_s21, %s1910_s21   ;;  %s1512_s20 = sphi %s1563_s20, %s1909_s20   ;;  %s1508_s19 = sphi %s1561_s19, %s1908_s19   ;;  %s1504_s18 = sphi %s1559_s18, %s1907_s18  }
   0x7   : > { %p42_p0 = scmp.ne.s32.totalorder %s1508_s19, %s1504_s18  ;;  %p1891_p1 = scmp.eq.s32.totalorder %s1580_s22, 0 }
   0x8   : > { %p156_p3 = scmp.eq.s32.totalorder %s1110_s23, 1  ;;  %p1111_p5 = scmp.ge.s32.totalorder %s1516_s21, 1 }
   0x9   : > { %p1589_p4 = por %p1891_p1, %p42_p0  ;;  %p163_p7 = scmp.lt.s32.totalorder %s1516_s21, 3 }
   0xa   : > { %p1594_p6 = por %p156_p3, %p42_p0  ;;  %s1518_s27 = smov [#allocation7]  }
   0xb   : > { %s1894_s24 = scalar_select %p1589_p4, 1, 0 }
   0xc   : > { %s1895_s25 = scalar_select %p1594_p6, 1, 0 }
   0xd   : > { %p1599_p8 = pnand %p1111_p5, %p163_p7  ;;  %s175_s28 = sshll.u32 %s1518_s27, 4  ;;  %s1603_s28 = int_to_ptr.vmem [resolvable:$true] %s175_s28 }
   0xe   : > { %s1519_s30 = smov [#allocation9]   ;;  %s1360_s9 = scalar_lea.hbm %s1886_s1, 1728 }
   0xf   : > { %p1256_p9 = pneg %p1599_p8  ;;  %s191_s6 = sshll.u32 %s1519_s30, 4  ;;  %s1614_s6 = int_to_ptr.vmem [resolvable:$true] %s191_s6 }
  0x10   : > { %p1361_p12 = scmp.ne.s32.totalorder %s1886_s1, %s1360_s9  ;;  %p1367_p5 = scmp.lt.u32.totalorder %s1360_s9, %s1886_s1 }
  0x11   : > { %p1610_p11 = pnand %p1256_p9, %p1891_p1 }
  0x13   : > { %p1362_p13 = pneg %p1610_p11 }
  0x15   : > { %p1363_p0 = pnand %p1362_p13, %p1361_p12 }
  0x17   : > { %p1364_p3 = pneg %p1363_p0 }
  0x19   : > { %p1369_p7 = pnand %p1367_p5, %p1364_p3 }
  0x1b   : > { %1372 = shalt.err (!%p1369_p7)
}
  0x1c   : > { %s1373_s14 = scalar_lea.vmem %s1603_s28, 1728  ;;  %p1381_p2 = scmp.lt.s32.totalorder %s1603_s28, %s1603_s28 }
  0x1d   : > { %p1374_p9 = scmp.ne.s32.totalorder %s1603_s28, %s1373_s14  ;;  %p1382_p12 = scmp.lt.s32.totalorder %s1373_s14, %s1373_s14 }
  0x1f   : > { %p1376_p10 = pnand %p1374_p9, %p1362_p13  ;;  %p1383_p0 = por %p1382_p12, %p1381_p2 }
  0x21   : > { %p1377_p1 = pneg %p1376_p10 }
  0x23   : > { %p1384_p6 = pnand %p1383_p0, %p1377_p1 }
  0x25   : > { %1387 = shalt.err (!%p1384_p6)
}
  0x26   : > { %s1520_s15 = smov 64   ;;  %s1521_s16 = smov 4  }
  0x27   : > { %1259 = dma.hbm_to_vmem [thread:$0]  (!%p1610_p11), %s1886_s1, 1728, %s1603_s28, [#allocation8], %s1520_s15, %s1520_s15, %s1521_s16  }
  0x28   : > { %s1388_s7 = scalar_lea.hbm %s1888_s3, 3456 }
  0x29   : > { %p1389_p1 = scmp.ne.s32.totalorder %s1888_s3, %s1388_s7  ;;  %p1395_p10 = scmp.lt.u32.totalorder %s1388_s7, %s1888_s3 }
  0x2b   : > { %p1391_p2 = pnand %p1389_p1, %p1362_p13 }
  0x2d   : > { %p1392_p6 = pneg %p1391_p2 }
  0x2f   : > { %p1397_p3 = pnand %p1395_p10, %p1392_p6 }
  0x31   : > { %1400 = shalt.err (!%p1397_p3)
}
  0x32   : > { %s1401_s28 = scalar_lea.vmem %s1614_s6, 3456  ;;  %p1409_p12 = scmp.lt.s32.totalorder %s1614_s6, %s1614_s6 }
  0x33   : > { %p1402_p5 = scmp.ne.s32.totalorder %s1614_s6, %s1401_s28  ;;  %p1410_p0 = scmp.lt.s32.totalorder %s1401_s28, %s1401_s28 }
  0x35   : > { %p1404_p7 = pnand %p1402_p5, %p1362_p13  ;;  %p1411_p1 = por %p1410_p0, %p1409_p12 }
  0x37   : > { %p1405_p9 = pneg %p1404_p7 }
  0x39   : > { %p1412_p2 = pnand %p1411_p1, %p1405_p9 }
  0x3b   : > { %1415 = shalt.err (!%p1412_p2)
}
  0x3c   : > { %1262 = dma.hbm_to_vmem [thread:$0]  (!%p1610_p11), %s1888_s3, 3456, %s1614_s6, [#allocation8], %s1520_s15, %s1520_s15, %s1521_s16  }
  0x3d   : > { %s1675_s29 = sadd.s32 1, %s1516_s21   ;;  %s29_s14 = sadd.s32 1, %s1512_s20 }
  0x3e   : > { %s26_s17 = ssub.s32 %s1516_s21, %s1675_s29  ;;  %p36_p13 = scmp.ne.s32.totalorder %s1512_s20, %s1508_s19 }
  0x3f   : > { %p27_p6 = scmp.eq.s32.totalorder %s26_s17, 0  ;;  %p37_p10 = scmp.eq.s32.totalorder %s1516_s21, 0 }
  0x40   : > { %p1898_p3 = scmp.eq.s32.totalorder %s1580_s22, 1  ;;  %p1273_p7 = scmp.lt.s32.totalorder %s1516_s21, 2 }
  0x41   : > { %s1691_s27 = scalar_select %p27_p6, %s1512_s20, %s29_s14  }
  0x42   : > { %p1685_p5 = por %p1898_p3, %p36_p13  ;;  %p38_p9 = por %p37_p10, %p36_p13 }
  0x43   : > { %s208_s30 = sand.u32 1, %s1512_s20   ;;  %s1178_s6 = sshll.u32 %s1516_s21, 7 }
  0x44   : > { %s1899_s23 = scalar_select %p1685_p5, 1, 0 }
  0x45   : > { %s1115_s7 = sshll.u32 %s208_s30, 3  ;;  %s1698_s10 = scalar_lea.hbm %s1885_s0, %s1178_s6 }
  0x46   : > { %s212_s11 = scalar_lea.vmem [#allocation4], %s1115_s7  ;;  %p1702_p11 = pnand %p1273_p7, %p38_p9 }
  0x47   : > { %s219_s28 = sshll.u32 %s212_s11, 4  ;;  %s1706_s13 = scalar_lea.sflag [#allocation5], %s208_s30  ;;  %s1700_s28 = int_to_ptr.vmem [resolvable:$true] %s219_s28 }
  0x48   : > { %s1416_s14 = scalar_lea.hbm %s1698_s10, 128  ;;  %p1418_p0 = pneg %p1702_p11 }
  0x49   : > { %p1417_p12 = scmp.ne.s32.totalorder %s1698_s10, %s1416_s14  ;;  %s1421_s6 = scalar_lea.hbm %s1885_s0, 256 }
  0x4a   : > { %p1422_p13 = scmp.lt.u32.totalorder %s1698_s10, %s1885_s0  ;;  %p1423_p6 = scmp.lt.u32.totalorder %s1421_s6, %s1416_s14 }
  0x4b   : > { %p1419_p1 = pnand %p1418_p0, %p1417_p12  ;;  %p1425_p3 = scmp.lt.u32.totalorder %s1416_s14, %s1698_s10 }
  0x4c   : > { %p1424_p10 = por %p1423_p6, %p1422_p13 }
  0x4d   : > { %p1420_p2 = pneg %p1419_p1 }
  0x4e   : > { %p1426_p7 = por %p1425_p3, %p1424_p10 }
  0x50   : > { %p1427_p9 = pnand %p1426_p7, %p1420_p2 }
  0x52   : > { %1430 = shalt.err (!%p1427_p9)
}
  0x53   : > { %s1431_s30 = scalar_lea.vmem %s1700_s28, 128  ;;  %s1522_s11 = smov [#allocation4]  }
  0x54   : > { %p1432_p12 = scmp.ne.s32.totalorder %s1700_s28, %s1431_s30  ;;  %s1436_s17 = sshll.u32 %s1522_s11, 4  ;;  %s1437_s17 = int_to_ptr.vmem [resolvable:$false] %s1436_s17 }
  0x55   : > { %s1438_s7 = scalar_lea.vmem %s1437_s17, 256  ;;  %p1439_p4 = scmp.lt.s32.totalorder %s1700_s28, %s1437_s17 }
  0x56   : > { %p1434_p1 = pnand %p1432_p12, %p1418_p0  ;;  %p1440_p13 = scmp.lt.s32.totalorder %s1438_s7, %s1431_s30 }
  0x58   : > { %p1435_p5 = pneg %p1434_p1  ;;  %p1441_p6 = por %p1440_p13, %p1439_p4 }
  0x5a   : > { %p1442_p10 = pnand %p1441_p6, %p1435_p5 }
  0x5c   : > { %1445 = shalt.err (!%p1442_p10)
}
  0x5d   : > { %1266 = dma.hbm_to_vmem [thread:$0]  (!%p1702_p11), %s1698_s10, 128, %s1700_s28, %s1706_s13, %s1520_s15, %s1520_s15, %s1521_s16  }
  0x5e   : > { %231 = sbr.rel (%p1599_p8) target bundleno = 656 (0x290), region = 40  ;;  %s1740_s14 = sand.u32 (!%p1599_p8), 1, %s1508_s19  }
  0x5f   : > { %s1119_s6 = sshll.u32 (!%p1599_p8), %s1740_s14, 3  ;;  %s234_s8 = scalar_lea.sflag (!%p1599_p8), [#allocation5], %s1740_s14 }
  0x60   : > { %s1744_s9 = scalar_lea.vmem (!%p1599_p8), [#allocation4], %s1119_s6  ;;  %p1901_p4 = scmp.ne.s32.totalorder (!%p1599_p8), %s1894_s24, 0 }
  0x65   : > { %1491 = dma.done.wait (%p1901_p4), %s234_s8, 128  }
  0x66   : > { %1493 = vsyncadd (%p1901_p4), %s234_s8, 4294967168  ;;  %p1902_p5 = scmp.eq.s32.totalorder %s1580_s22, 0 }
  0x68   : > { %1495 = dma.done.wait (%p1902_p5), [#allocation8], 5184   ;;  %p1903_p8 = pmov %p1902_p5 }
  0x69   : > { %vm273_vm0 = vcmask 588800   ;;  %v1523_v0 = vmov 0.0   ;;  %vm276_vm1 = vcmask 582656   ;;  %vm1524_vm2 = vmmov 0   ;;  %v1318_v1 = vld [vmem:[#allocation7 + $0x24] sm:$0xff]   ;;  %v1320_v3 = vld [vmem:[#allocation7 + $0x2c] sm:$0xff]  }
  0x6a   : > { %1497 = vsyncadd (%p1903_p8), [#allocation8], 4294962112  ;;  %1202 = vmatprep.subr.bf16.mxu0 %v1523_v0  ;;  %278 = vst [vmem:[#allocation3] sm:$0xff] %v1523_v0  ;;  %1216 = vmatprep.subr.bf16.mxu1 %v1523_v0  ;;  %v1319_v2 = vld [vmem:[#allocation7] sm:$0xff]   ;;  %v1321_v4 = vld [vmem:[#allocation7 + $0x8] sm:$0xff]   ;;  %vm290_vm3 = vcmask 523264  }
  0x6b   : > { %283 = vst [vmem:[#allocation3 + $0x20] sm:$0x3] %v1523_v0  ;;  %274 = vst.msk [vmem:[#allocation2] sm:$0xff] %vm273_vm0, %v1523_v0  ;;  %1212 = vmatprep.mubr.msk.bf16.mxu0 %vm1524_vm2, %v1523_v0  ;;  %1226 = vmatprep.mubr.msk.bf16.mxu1 %vm1524_vm2, %v1523_v0  ;;  %v1322_v5 = vld [vmem:[#allocation7 + $0x34] sm:$0xff]   ;;  %v1324_v7 = vld [vmem:[#allocation7 + $0x3c] sm:$0xff]   ;;  %vm348_vm4 = vcmask 1043456  }
  0x6c   : > { %275 = vst.msk [vmem:[#allocation2 + $0x8] sm:$0xff] %vm273_vm0, %v1523_v0  ;;  %1203 = vmatpush3.bf16.msra.mxu0 %v1318_v1  ;;  %1217 = vmatpush3.bf16.msra.mxu1 %v1319_v2  ;;  %v1323_v6 = vld [vmem:[#allocation7 + $0x10] sm:$0xff]   ;;  %v1326_v9 = vld [vmem:[#allocation7 + $0x44] ss:$0 sps:$4 sm:$0xff]   ;;  %v1325_v12 = vld [vmem:[#allocation7 + $0x18] sm:$0xff]   ;;  %v1525_v32 = vmov 0  }
  0x6d   : > { %277 = vst.msk [vmem:[#allocation2 + $0x10] sm:$0x3] %vm276_vm1, %v1523_v0  ;;  %1204 = vmatprep.subr.bf16.mxu0 %v1523_v0  ;;  %1218 = vmatprep.subr.bf16.mxu1 %v1523_v0  ;;  %v1181_v8 = vld [vmem:[%s1744_s9] sm:$0xff]   ;;  %v1327_v13 = vld [vmem:[#allocation7 + $0x20] ss:$0 sps:$4 sm:$0xff]   ;;  %v350_v14 = vsel %vm348_vm4, %v1326_v9, 0 }
  0x6e   : > { %v1182_v10 = vunpack.c.l.bf16 %v1181_v8  ;;  %v1183_v11 = vunpack.c.h.bf16 %v1181_v8  ;;  %v424_v15 = vsel %vm348_vm4, %v1327_v13, 0  ;;  %v1328_v16 = vld [vmem:[#allocation7 + $0x48] sm:$0xff]   ;;  %v1329_v23 = vld [vmem:[#allocation7 + $0x50] sm:$0xff]   ;;  %v1330_v24 = vld [vmem:[#allocation7 + $0x58] sm:$0xff]   ;;  %vm279_vm5 = vcmask 130048   ;;  %s1122_s15 = sshll.u32 %s1740_s14, 4 }
  0x6f   : > { %v1331_v25 = vld [vmem:[#allocation7 + $0x60] sm:$0xff]   ;;  %v1332_v26 = vld [vmem:[#allocation7 + $0x68] ss:$0 sps:$4 sm:$0xff]   ;;  %v1333_v31 = vld [vmem:[#allocation9] sm:$0xff]   ;;  %280 = vst.msk [vmem:[#allocation3 + $0x8] sm:$0xff] %vm279_vm5, %v1523_v0  ;;  %vm284_vm6 = vcmask 123904  }
  0x70   : > { %1205 = vmatpush3.bf16.msra.mxu0 %v1320_v3  ;;  %1219 = vmatpush3.bf16.msra.mxu1 %v1321_v4  ;;  %291 = vst.msk [vmem:[#allocation2 + $0x1] sm:$0xff] %vm290_vm3, %v1182_v10  ;;  %292 = vst.msk [vmem:[#allocation2 + $0x9] sm:$0xff] %vm290_vm3, %v1183_v11  ;;  %v511_v29 = vsel %vm348_vm4, %v1332_v26, 0  ;;  %v1335_v33 = vld [vmem:[#allocation9 + $0x48] sm:$0xff]   ;;  %v1337_v35 = vld [vmem:[#allocation9 + $0x50] sm:$0xff]   ;;  %vm569_vm8 = vcmask 1040384  }
  0x71   : > { %1206 = vmatprep.subr.bf16.mxu0 %v1523_v0  ;;  %1220 = vmatprep.subr.bf16.mxu1 %v1523_v0  ;;  %v1334_v34 = vld [vmem:[#allocation9 + $0x8] sm:$0xff]   ;;  %v1336_v36 = vld [vmem:[#allocation9 + $0x10] sm:$0xff]   ;;  %v1338_v37 = vld [vmem:[#allocation9 + $0x18] sm:$0xff]   ;;  %282 = vst.msk [vmem:[#allocation3 + $0x18] sm:$0xff] %vm279_vm5, %v1523_v0  ;;  %vm630_vm7 = vsmask.f32 7424 }
  0x72   : > { %v1339_v38 = vld [vmem:[#allocation9 + $0x58] sm:$0xff]   ;;  %v1340_v39 = vld [vmem:[#allocation9 + $0x20] sm:$0xff]   ;;  %v1342_v41 = vld [vmem:[#allocation9 + $0x28] sm:$0xff]   ;;  %285 = vst.msk [vmem:[#allocation3 + $0x28] sm:$0x3] %vm284_vm6, %v1523_v0  ;;  %vm883_vm9 = vcmask 1046528  }
  0x73   : > { %v1341_v40 = vld [vmem:[#allocation9 + $0x60] sm:$0xff]   ;;  %v1343_v42 = vld [vmem:[#allocation9 + $0x68] sm:$0xff]   ;;  %v1344_v43 = vld [vmem:[#allocation9 + $0x30] sm:$0xff]   ;;  %s271_s28 = scalar_lea.vmem [#allocation10], %s1122_s15  ;;  %s1179_s13 = sshll.u32 %s1580_s22, 8 }
  0x74   : > { %1207 = vmatpush3.bf16.msra.mxu0 %v1322_v5  ;;  %1221 = vmatpush3.bf16.msra.mxu1 %v1323_v6  ;;  %v1345_v44 = vld [vmem:[#allocation9 + $0x70] sm:$0xff]   ;;  %v1346_v45 = vld [vmem:[#allocation9 + $0x38] sm:$0xff]   ;;  %v1348_v47 = vld [vmem:[#allocation9 + $0x40] sm:$0xff]   ;;  %s1018_s12 = sshll.u32 %s271_s28, 4  ;;  %s1841_s17 = scalar_lea.hbm %s1890_s5, %s1179_s13  ;;  %s1836_s12 = int_to_ptr.vmem [resolvable:$true] %s1018_s12 }
  0x75   : > { %1208 = vmatprep.subr.bf16.mxu0 %v1523_v0  ;;  %1222 = vmatprep.subr.bf16.mxu1 %v1523_v0  ;;  %v1347_v46 = vld [vmem:[#allocation9 + $0x78] sm:$0xff]   ;;  %v1349_v48 = vld [vmem:[#allocation9 + $0x80] sm:$0xff]   ;;  %v1350_v55 = vld [vmem:[#allocation9 + $0x88] sm:$0xff]   ;;  %s1005_s7 = scalar_lea.sflag [#allocation6], %s1740_s14  ;;  %s1446_s6 = scalar_lea.vmem %s1836_s12, 256 }
  0x76   : > { %v580_v49 = vld [vmem:[#allocation3 + $0x8] sm:$0xff]  ;;  %p1447_p11 = scmp.ne.s32.totalorder %s1836_s12, %s1446_s6  ;;  %p1904_p0 = scmp.ne.s32.totalorder %s1899_s23, 0 }
  0x77   : > { %v305_v17 = vld [vmem:[#allocation2 + $0x1] sm:$0xff]  ;;  %v306_v18 = vld [vmem:[#allocation2 + $0x9] sm:$0xff]  ;;  %v1141_v11 = vld [vmem:[%s1887_s2] ss:$0 sm:$0xff]  ;;  %s1526_s22 = smov [#allocation10]  }
  0x78   : > { %1209 = vmatpush3.bf16.msra.mxu0 %v1324_v7  ;;  %1223 = vmatpush3.bf16.msra.mxu1 %v1325_v12  ;;  %v293_v19 = vld [vmem:[#allocation2] sm:$0xff]  ;;  %v307_v20 = vpack.c.bf16 %v306_v18, %v305_v17  ;;  %v294_v21 = vld [vmem:[#allocation2 + $0x8] sm:$0xff]  ;;  %v582_v50 = vld [vmem:[#allocation3 + $0x18] sm:$0xff]  ;;  %p1448_p2 = pnand %p1447_p11, %p1904_p0  ;;  %s1450_s8 = sshll.u32 %s1526_s22, 4  ;;  %s1451_s8 = int_to_ptr.vmem [resolvable:$false] %s1450_s8 }
  0x79   : > { %1210 = vmatprep.subr.bf16.mxu0 %v1523_v0  ;;  %1224 = vmatprep.subr.bf16.mxu1 %v1523_v0  ;;  %v295_v22 = vpack.c.bf16 %v294_v21, %v293_v19  ;;  %v467_v27 = vld [vmem:[#allocation2 + $0x2] sm:$0xff]  ;;  %v468_v28 = vld [vmem:[#allocation2 + $0xa] sm:$0xff]  ;;  %v584_v52 = vpack.c.bf16 %v582_v50, %v580_v49  ;;  %v606_v54 = vld [vmem:[#allocation3 + $0x28] sm:$0x1]  ;;  %s1452_s9 = scalar_lea.vmem %s1451_s8, 512  ;;  %p1453_p7 = scmp.lt.s32.totalorder %s1836_s12, %s1451_s8 }
  0x7a   : > { %v469_v30 = vpack.c.bf16 %v468_v28, %v467_v27  ;;  %v604_v51 = vld [vmem:[#allocation3 + $0x8] sm:$0xfe]  ;;  %v610_v56 = vpack.c.bf16 %v606_v54, %v606_v54  ;;  %v1355_v49 = vld [vmem:[#allocation9 + $0xb0] sm:$0xff]   ;;  %p1449_p3 = pneg %p1448_p2  ;;  %p1454_p9 = scmp.lt.s32.totalorder %s1452_s9, %s1446_s6 }
  0x7b   : > { %v608_v53 = vpack.c.bf16 %v582_v50, %v604_v51  ;;  %v1357_v51 = vld [vmem:[#allocation9 + $0xc0] sm:$0xff]  }
  0x7c   : > { %1211 = vmatpush3.bf16.msra.mxu0 %v350_v14  ;;  %1225 = vmatpush3.bf16.msra.mxu1 %v424_v15  ;;  %v651_v60 = vshll.u32 %v610_v56, 16  ;;  %v1359_v56 = vld [vmem:[#allocation9 + $0xd0] sm:$0xff]   ;;  %p1455_p12 = por %p1454_p9, %p1453_p7 }
  0x7d   : > { %1230 = vmatprep.subr.bf16.mxu0 %v1523_v0  ;;  %713 = vmatprep.subr.bf16.mxu1 %v1525_v32  ;;  %v644_v57 = vshrl.u32 %v608_v53, 16  ;;  %v646_v58 = vshll.u32 %v608_v53, 16  ;;  %v1358_v53 = vld [vmem:[#allocation9 + $0xc8] sm:$0xff]  }
  0x7e   : > { %v653_v62 = vrot.slane %v651_v60, 1  ;;  %p1456_p1 = pnand %p1455_p12, %p1449_p3 }
  0x7f   : > { %1213 = vmatmul.mubr.msk.bf16.vlgmr.msra.gmra.mrb[0].mxu0 %vm273_vm0, %v307_v20  ;;  %1227 = vmatmul.mubr.msk.bf16.vlgmr.msra.gmra.mrb[0].mxu1 %vm273_vm0, %v295_v22  ;;  %v648_v59 = vrot.slane %v646_v58, 1 }
  0x80   : > { %1231 = vmatpush3.bf16.msra.mxu0 %v1328_v16  ;;  %1240 = vmatprep.mubr.msk.bf16.mxu0 %vm1524_vm2, %v1523_v0 }
  0x81   : > { %1232 = vmatprep.subr.bf16.mxu0 %v1523_v0  ;;  %714 = vmatpush1.bf16.msra.mxu1 %v1335_v33  ;;  %v649_v61 = vor.u32 %v648_v59, %v644_v57 }
  0x82   : > { %715 = vmatprep.subr.bf16.mxu1 %v1525_v32 }
  0x83   : > { %v654_v63 = vsel %vm630_vm7, %v649_v61, %v653_v62 }
  0x84   : > { %1233 = vmatpush3.bf16.msra.mxu0 %v1329_v23  ;;  %1151 = vmatprep.mubr.msk.bf16.mxu1 %vm279_vm5, %v654_v63 }
  0x85   : > { %1234 = vmatprep.subr.bf16.mxu0 %v1523_v0  ;;  %716 = vmatpush1.bf16.msra.mxu1 %v1337_v35 }
  0x86   : > { %717 = vmatprep.subr.bf16.mxu1 %v1525_v32 }
  0x88   : > { %1235 = vmatpush3.bf16.msra.mxu0 %v1330_v24  ;;  %v853_v24 = vld [vmem:[#allocation3 + $0x8] sm:$0xfc] }
  0x89   : > { %1236 = vmatprep.subr.bf16.mxu0 %v1523_v0  ;;  %718 = vmatpush1.bf16.msra.mxu1 %v1339_v38  ;;  %v857_v28 = vpack.c.bf16 %v582_v50, %v853_v24  ;;  %v1356_v50 = vld [vmem:[#allocation9 + $0xb8] sm:$0xff]  }
  0x8a   : > { %719 = vmatprep.subr.bf16.mxu1 %v1525_v32 }
  0x8c   : > { %1237 = vmatpush3.bf16.msra.mxu0 %v1331_v25  ;;  %v855_v25 = vld [vmem:[#allocation3 + $0x28] sm:$0x3] }
  0x8d   : > { %1238 = vmatprep.subr.bf16.mxu0 %v1523_v0  ;;  %720 = vmatpush1.bf16.msra.mxu1 %v1341_v40 }
  0x8e   : > { %721 = vmatprep.subr.bf16.mxu1 %v1525_v32 }
  0x90   : > { %1239 = vmatpush3.bf16.msra.mxu0 %v511_v29  ;;  %v859_v29 = vpack.c.bf16 %v855_v25, %v855_v25 }
  0x91   : > { %811 = vmatprep.subr.bf16.mxu0 %v1525_v32  ;;  %722 = vmatpush1.bf16.msra.mxu1 %v1343_v42 }
  0x92   : > { %723 = vmatprep.subr.bf16.mxu1 %v1525_v32 }
  0x93   : > { %1241 = vmatmul.mubr.msk.bf16.vlgmr.msra.gmra.mrb[4].mxu0 %vm273_vm0, %v469_v30 }
  0x94   : > { %812 = vmatpush1.bf16.msra.mxu0 %v1333_v31  ;;  %1161 = vmatprep.mubr.msk.bf16.mxu0 %vm279_vm5, %v584_v52 }
  0x95   : > { %813 = vmatprep.subr.bf16.mxu0 %v1525_v32  ;;  %724 = vmatpush1.bf16.msra.mxu1 %v1345_v44 }
  0x96   : > { %725 = vmatprep.subr.bf16.mxu1 %v1525_v32 }
  0x98   : > { %814 = vmatpush1.bf16.msra.mxu0 %v1334_v34 }
  0x99   : > { %815 = vmatprep.subr.bf16.mxu0 %v1525_v32  ;;  %726 = vmatpush1.bf16.msra.mxu1 %v1347_v46  ;;  %v1352_v46 = vld [vmem:[#allocation9 + $0x98] sm:$0xff]  }
  0x9a   : > { %727 = vmatprep.subr.bf16.mxu1 %v1525_v32 }
  0x9c   : > { %816 = vmatpush1.bf16.msra.mxu0 %v1336_v36  ;;  %v887_v36 = vrot.slane %v857_v28, 1 }
  0x9d   : > { %817 = vmatprep.subr.bf16.mxu0 %v1525_v32  ;;  %728 = vmatpush1.bf16.msra.mxu1 %v1349_v48  ;;  %v1354_v48 = vld [vmem:[#allocation9 + $0xa8] sm:$0xff]  }
  0x9e   : > { %729 = vmatprep.subr.bf16.mxu1 %v1525_v32 }
  0xa0   : > { %818 = vmatpush1.bf16.msra.mxu0 %v1338_v37  ;;  %v888_v37 = vrot.slane %v859_v29, 1 }
  0xa1   : > { %819 = vmatprep.subr.bf16.mxu0 %v1525_v32  ;;  %730 = vmatpush1.bf16.msra.mxu1 %v1350_v55 }
  0xa2   : > { %948 = vmatprep.subr.bf16.mxu1 %v1525_v32  ;;  %v889_v44 = vsel %vm883_vm9, %v887_v36, %v888_v37 }
  0xa4   : > { %820 = vmatpush1.bf16.msra.mxu0 %v1340_v39 }
  0xa5   : > { %821 = vmatprep.subr.bf16.mxu0 %v1525_v32 }
  0xa8   : > { %822 = vmatpush1.bf16.msra.mxu0 %v1342_v41 }
  0xa9   : > { %823 = vmatprep.subr.bf16.mxu0 %v1525_v32 }
  0xac   : > { %824 = vmatpush1.bf16.msra.mxu0 %v1344_v43  ;;  %v1351_v43 = vld [vmem:[#allocation9 + $0x90] sm:$0xff]  }
  0xad   : > { %825 = vmatprep.subr.bf16.mxu0 %v1525_v32 }
  0xb0   : > { %826 = vmatpush1.bf16.msra.mxu0 %v1346_v45 }
  0xb1   : > { %827 = vmatprep.subr.bf16.mxu0 %v1525_v32 }
  0xb4   : > { %828 = vmatpush1.bf16.msra.mxu0 %v1348_v47  ;;  %v1353_v47 = vld [vmem:[#allocation9 + $0xa0] sm:$0xff]  }
 0x152   : > { %v386_v0 = vpop.f32.mrb[0].mxu0  ;;  %v460_v1 = vpop.f32.mrb[0].mxu1 }
 0x153   : > { %v1214_v2 = vpop.f32.mrb[1].mxu0  ;;  %v461_v3 = vadd.f32 %v460_v1, %v386_v0  ;;  %v1228_v4 = vpop.f32.mrb[1].mxu1 }
 0x154   : > { %v389_v5 = vpop.f32.mrb[2].mxu0  ;;  %v463_v6 = vpop.f32.mrb[2].mxu1 }
 0x155   : > { %v1215_v7 = vpop.f32.mrb[3].mxu0  ;;  %v464_v8 = vadd.f32 %v463_v6, %v389_v5  ;;  %v1229_v9 = vpop.f32.mrb[3].mxu1 }
 0x156   : > { %v1172_v7 = vld [vmem:[%s1889_s4] ss:$0 sm:$0xff] }
 0x166   : > { %v547_v10 = vpop.f32.mrb[4].mxu0 }
 0x167   : > { %v554_v12 = vadd.f32 %v547_v10, %v461_v3  ;;  %v1242_v13 = vpop.f32.mrb[5].mxu0 }
 0x168   : > { %v550_v14 = vpop.f32.mrb[6].mxu0 }
 0x169   : > { %v563_v15 = vadd.f32 %v1141_v11, %v554_v12  ;;  %v555_v16 = vadd.f32 %v550_v14, %v464_v8  ;;  %v1243_v17 = vpop.f32.mrb[7].mxu0 }
 0x16b   : > { %v565_v18 = vmax.f32 %v563_v15, 0.0  ;;  %v564_v19 = vadd.f32 %v1141_v11, %v555_v16 }
 0x16d   : > { %v570_v20 = vrot.slane %v565_v18, 7  ;;  %v566_v21 = vmax.f32 %v564_v19, 0.0 }
 0x16f   : > { %576 = vst [vmem:[#allocation3] sm:$0xfe] %v570_v20  ;;  %v571_v22 = vrot.slane %v566_v21, 7 }
 0x171   : > { %v572_v23 = vsel %vm569_vm8, %v570_v20, %v571_v22  ;;  %578 = vst [vmem:[#allocation3 + $0x20] sm:$0x1] %v571_v22 }
 0x176   : > { %v579_v26 = vld [vmem:[#allocation3] sm:$0xff] }
 0x177   : > { %v603_v27 = vld [vmem:[#allocation3] sm:$0xfe]  ;;  %v583_v30 = vpack.c.bf16 %v572_v23, %v579_v26 }
 0x178   : > { %v607_v31 = vpack.c.bf16 %v572_v23, %v603_v27  ;;  %v605_v33 = vld [vmem:[#allocation3 + $0x20] sm:$0x1]  ;;  %v852_v54 = vld [vmem:[#allocation3] sm:$0xfc] }
 0x179   : > { %844 = vmatmul.mubr.bf16.vlgmr.msra.gmra.mrb[8].mxu0 %v583_v30  ;;  %v609_v34 = vpack.c.bf16 %v605_v33, %v605_v33  ;;  %v854_v52 = vld [vmem:[#allocation3 + $0x20] sm:$0x3]  ;;  %v856_v57 = vpack.c.bf16 %v572_v23, %v852_v54 }
 0x17a   : > { %v634_v35 = vshll.u32 %v607_v31, 16  ;;  %v632_v38 = vshrl.u32 %v607_v31, 16  ;;  %v858_v55 = vpack.c.bf16 %v854_v52, %v854_v52 }
 0x17b   : > { %v639_v40 = vshll.u32 %v609_v34, 16  ;;  %v884_v59 = vrot.slane %v856_v57, 1 }
 0x17c   : > { %v636_v39 = vrot.slane %v634_v35, 1  ;;  %v885_v58 = vrot.slane %v858_v55, 1 }
 0x17d   : > { %v641_v42 = vrot.slane %v639_v40, 1 }
 0x17e   : > { %v637_v41 = vor.u32 %v636_v39, %v632_v38  ;;  %v886_v60 = vsel %vm883_vm9, %v884_v59, %v885_v58 }
 0x180   : > { %v642_v45 = vsel %vm630_vm7, %v637_v41, %v641_v42 }
 0x181   : > { %746 = vmatmul.mubr.bf16.vlgmr.msra.gmra.mrb[4].mxu1 %v642_v45 }
 0x182   : > { %949 = vmatpush1.bf16.msra.mxu1 %v1351_v43  ;;  %1171 = vmatprep.mubr.msk.bf16.mxu1 %vm279_vm5, %v889_v44 }
 0x183   : > { %950 = vmatprep.subr.bf16.mxu1 %v1525_v32 }
 0x186   : > { %951 = vmatpush1.bf16.msra.mxu1 %v1352_v46 }
 0x187   : > { %952 = vmatprep.subr.bf16.mxu1 %v1525_v32 }
 0x18a   : > { %953 = vmatpush1.bf16.msra.mxu1 %v1353_v47 }
 0x18b   : > { %954 = vmatprep.subr.bf16.mxu1 %v1525_v32 }
 0x18e   : > { %955 = vmatpush1.bf16.msra.mxu1 %v1354_v48 }
 0x18f   : > { %956 = vmatprep.subr.bf16.mxu1 %v1525_v32 }
 0x192   : > { %957 = vmatpush1.bf16.msra.mxu1 %v1355_v49 }
 0x193   : > { %958 = vmatprep.subr.bf16.mxu1 %v1525_v32 }
 0x196   : > { %959 = vmatpush1.bf16.msra.mxu1 %v1356_v50 }
 0x197   : > { %960 = vmatprep.subr.bf16.mxu1 %v1525_v32 }
 0x19a   : > { %961 = vmatpush1.bf16.msra.mxu1 %v1357_v51 }
 0x19b   : > { %962 = vmatprep.subr.bf16.mxu1 %v1525_v32 }
 0x19e   : > { %963 = vmatpush1.bf16.msra.mxu1 %v1358_v53 }
 0x19f   : > { %964 = vmatprep.subr.bf16.mxu1 %v1525_v32 }
 0x1a2   : > { %965 = vmatpush1.bf16.msra.mxu1 %v1359_v56 }
 0x1a5   : > { %981 = vmatmul.mubr.bf16.vlgmr.msra.gmra.mrb[8].mxu1 %v886_v60 }
 0x24c   : > { %v845_v61 = vpop.f32.mrb[8].mxu0 }
 0x24d   : > { %v847_v62 = vpop.f32.mrb[9].mxu0 }
 0x24e   : > { %v848_v63 = vpop.f32.mrb[10].mxu0 }
 0x24f   : > { %v850_v0 = vpop.f32.mrb[11].mxu0 }
 0x254   : > { %v747_v1 = vpop.f32.mrb[4].mxu1 }
 0x255   : > { %v846_v2 = vadd.f32 %v845_v61, %v747_v1  ;;  %v749_v3 = vpop.f32.mrb[5].mxu1 }
 0x256   : > { %v750_v4 = vpop.f32.mrb[6].mxu1 }
 0x257   : > { %v849_v5 = vadd.f32 %v848_v63, %v750_v4  ;;  %v752_v6 = vpop.f32.mrb[7].mxu1 }
 0x278   : > { %v982_v32 = vpop.f32.mrb[8].mxu1 }
 0x279   : > { %v989_v8 = vadd.f32 %v982_v32, %v846_v2  ;;  %v984_v9 = vpop.f32.mrb[9].mxu1 }
 0x27a   : > { %v985_v10 = vpop.f32.mrb[10].mxu1 }
 0x27b   : > { %v998_v11 = vadd.f32 %v1172_v7, %v989_v8  ;;  %v990_v12 = vadd.f32 %v985_v10, %v849_v5  ;;  %v987_v13 = vpop.f32.mrb[11].mxu1 }
 0x27d   : > { %v1000_v14 = vmax.f32 %v998_v11, 0.0  ;;  %v999_v15 = vadd.f32 %v1172_v7, %v990_v12 }
 0x27f   : > { %1002 = vst [vmem:[%s271_s28] sm:$0xff] %v1000_v14  ;;  %v1001_v16 = vmax.f32 %v999_v15, 0.0 }
 0x281   : > { %1003 = vst [vmem:[%s271_s28 + $0x8] sm:$0xff] %v1001_v16 }
 0x282   : > { %1459 = shalt.err (!%p1456_p1)
}
 0x283   : > { %s1460_s24 = scalar_lea.hbm %s1841_s17, 256  ;;  %s1464_s16 = scalar_lea.hbm %s1890_s5, 512 }
 0x284   : > { %p1461_p13 = scmp.ne.s32.totalorder %s1841_s17, %s1460_s24  ;;  %p1465_p4 = scmp.lt.u32.totalorder %s1841_s17, %s1890_s5 }
 0x285   : > { %p1466_p5 = scmp.lt.u32.totalorder %s1464_s16, %s1460_s24  ;;  %p1468_p11 = scmp.lt.u32.totalorder %s1460_s24, %s1841_s17 }
 0x286   : > { %p1462_p6 = pnand %p1461_p13, %p1904_p0 }
 0x287   : > { %p1467_p8 = por %p1466_p5, %p1465_p4 }
 0x288   : > { %p1463_p10 = pneg %p1462_p6 }
 0x289   : > { %p1469_p2 = por %p1468_p11, %p1467_p8 }
 0x28b   : > { %p1470_p3 = pnand %p1469_p2, %p1463_p10 }
 0x28d   : > { %1473 = shalt.err (!%p1470_p3)
}
 0x28e   : > { %s1527_s13 = smov 128   ;;  %s1528_s30 = smov 8  }
 0x28f   : > { %1254 = dma.vmem_to_hbm [thread:$0]  (%p1904_p0), %s1836_s12, 256, %s1841_s17, %s1005_s7, %s1527_s13, %s1527_s13, %s1528_s30  }
 0x290 PF: > { %s1033_s11 = sand.u32 1, %s1504_s18   ;;  %p1905_p7 = scmp.ne.s32.totalorder %s1895_s25, 0 }
 0x291   : > { %p1906_p9 = scmp.ge.s32.totalorder %s1516_s21, 2  ;;  %s1034_s6 = scalar_lea.sflag [#allocation6], %s1033_s11 }
 0x293   : > { %p1268_p12 = pnand %p1906_p9, %p1905_p7 }
 0x295   : > { %1499 = dma.done.wait (!%p1268_p12), %s1034_s6, 256  }
 0x296   : > { %1501 = vsyncadd (!%p1268_p12), %s1034_s6, 4294967040  ;;  %p19_p1 = scmp.ge.s32.totalorder %s1675_s29, 4   ;;  %s1907_s18 = smov %s1508_s19 }
 0x297   : > { %s1908_s19 = smov %s1512_s20  ;;  %s1909_s20 = smov %s1691_s27 }
 0x298   : > { %s1910_s21 = smov %s1675_s29  ;;  %21 = sbr.rel (!%p19_p1) target bundleno = 6 (0x6), region = 97 }
 0x29f   :  { %1039 = vsyncpa [#allocation5], 1 }
 0x2a0   :  { %1041 = vsyncpa [#allocation5 + $0x1], 1 }
 0x2a1   :  { %1042 = vsyncpa [#allocation8], 1 }
 0x2a2   :  { %1043 = vsyncpa [#allocation6], 1 }
 0x2a3   :  { %1045 = vsyncpa [#allocation6 + $0x1], 1 }

</bundles_post_ra>
